<compile_context>
chip_gen: v5e
topology: v5e:2x2
jax: 0.10.0
libtpu: 0.0.40
codegen_flags: <defaults>
</compile_context>

<pallas_src>
import math
import functools

import jax
import jax.numpy as jnp
from jax.experimental import pallas as pl
from jax.experimental.pallas import tpu as pltpu


# ----------------------------- constants / hw-aware budgets -----------------------------

NEG_MASK = -1e9          # large-but-safe mask value (finfo.min overflows to -inf)
REL_NUM_BUCKETS = 32
REL_MAX_DISTANCE = 128


def _detect_vmem_capacity():
    try:
        info = pltpu.get_tpu_info()
        cap = getattr(info, "vmem_capacity_bytes", None)
        return int(cap) if cap else None
    except Exception:
        return None


_VMEM_CAP = _detect_vmem_capacity()
if _VMEM_CAP is None:
    VMEM_LIMIT = 48 * 1024 * 1024          # safe everywhere (v7x has 64 MiB total)
    _BIG_VMEM = False
else:
    VMEM_LIMIT = int(min((_VMEM_CAP * 3) // 4, 100 * 1024 * 1024))
    _BIG_VMEM = _VMEM_CAP >= 96 * 1024 * 1024

# Bigger blocks on 128 MiB parts (v5e/v6e); conservative on v7x (64 MiB).
MM_TM = 512 if _BIG_VMEM else 256
MM_TN = 1024 if _BIG_VMEM else 512
MM_TK = 1024 if _BIG_VMEM else 512
FFN_TF = 1024 if _BIG_VMEM else 512
LM_TV = 1024 if _BIG_VMEM else 512


def _round_up(x, m):
    return (x + m - 1) // m * m


def _tile(dim, pref, align):
    """Full-dim block (no padding) when small, else an (8,128)-aligned tile."""
    if dim <= pref:
        return dim, dim
    t = _round_up(min(pref, dim), align)
    return t, _round_up(dim, t)


def _pad2d(x, rows, cols):
    pr, pc = rows - x.shape[0], cols - x.shape[1]
    if pr == 0 and pc == 0:
        return x
    return jnp.pad(x, ((0, pr), (0, pc)))


# ----------------------------- tiled matmul -----------------------------

def _mm_kernel(a_ref, b_ref, o_ref, acc_ref):
    @pl.when(pl.program_id(2) == 0)
    def _():
        acc_ref[...] = jnp.zeros_like(acc_ref)
    acc_ref[...] += jnp.dot(a_ref[...], b_ref[...],
                            preferred_element_type=jnp.float32)
    @pl.when(pl.program_id(2) == pl.num_programs(2) - 1)
    def _():
        o_ref[...] = acc_ref[...].astype(o_ref.dtype)


def pallas_matmul(a, b, out_dtype=jnp.bfloat16):
    M, K = a.shape
    K2, N = b.shape
    assert K == K2
    tm, Mp = _tile(M, MM_TM, 8)
    tn, Np = _tile(N, MM_TN, 128)
    tk, Kp = _tile(K, MM_TK, 128)
    a_p = _pad2d(a.astype(jnp.bfloat16), Mp, Kp)
    b_p = _pad2d(b.astype(jnp.bfloat16), Kp, Np)   # weights already bf16 -> usually no-op
    out = pl.pallas_call(
        _mm_kernel,
        out_shape=jax.ShapeDtypeStruct((Mp, Np), out_dtype),
        grid=(Mp // tm, Np // tn, Kp // tk),
        in_specs=[pl.BlockSpec((tm, tk), lambda i, j, k: (i, k)),
                  pl.BlockSpec((tk, tn), lambda i, j, k: (k, j))],
        out_specs=pl.BlockSpec((tm, tn), lambda i, j, k: (i, j)),
        scratch_shapes=[pltpu.VMEM((tm, tn), jnp.float32)],
        compiler_params=pltpu.CompilerParams(
            dimension_semantics=("parallel", "parallel", "arbitrary"),
            vmem_limit_bytes=VMEM_LIMIT),
    )(a_p, b_p)
    if (Mp, Np) != (M, N):
        out = out[:M, :N]
    return out


# ----------------------------- fused RMSNorm + matmul -----------------------------

def _rms_mm_kernel(x_ref, g_ref, w_ref, o_ref, *, eps):
    x = x_ref[...].astype(jnp.float32)
    var = jnp.mean(x * x, axis=-1, keepdims=True)
    xn = x * jax.lax.rsqrt(var + eps) * g_ref[...]
    o_ref[...] = jnp.dot(xn.astype(jnp.bfloat16), w_ref[...],
                         preferred_element_type=jnp.float32).astype(o_ref.dtype)


def pallas_rms_matmul(x2d, gamma, w, eps=1e-6, out_dtype=jnp.bfloat16):
    M, D = x2d.shape
    N = w.shape[1]
    tm, Mp = _tile(M, 256, 8)
    tn, Np = _tile(N, MM_TN, 128)
    x_p = _pad2d(x2d.astype(jnp.bfloat16), Mp, D)
    w_p = _pad2d(w.astype(jnp.bfloat16), D, Np)
    out = pl.pallas_call(
        functools.partial(_rms_mm_kernel, eps=eps),
        out_shape=jax.ShapeDtypeStruct((Mp, Np), out_dtype),
        grid=(Mp // tm, Np // tn),
        in_specs=[pl.BlockSpec((tm, D), lambda i, j: (i, 0)),
                  pl.BlockSpec((1, D), lambda i, j: (0, 0)),
                  pl.BlockSpec((D, tn), lambda i, j: (0, j))],
        out_specs=pl.BlockSpec((tm, tn), lambda i, j: (i, j)),
        compiler_params=pltpu.CompilerParams(
            dimension_semantics=("parallel", "parallel"),
            vmem_limit_bytes=VMEM_LIMIT),
    )(x_p, gamma, w_p)
    if (Mp, Np) != (M, N):
        out = out[:M, :N]
    return out


# ----------------------------- fused RMSNorm + FFN (wi -> relu -> wo) -----------------------------

def _ffn_kernel(x_ref, g_ref, wi_ref, wo_ref, o_ref, xn_ref, acc_ref, *, eps):
    f = pl.program_id(1)

    @pl.when(f == 0)
    def _():
        # RMSNorm hoisted out of the F-reduction loop: computed once per row tile.
        x = x_ref[...].astype(jnp.float32)
        var = jnp.mean(x * x, axis=-1, keepdims=True)
        xn_ref[...] = (x * jax.lax.rsqrt(var + eps) * g_ref[...]).astype(jnp.bfloat16)
        acc_ref[...] = jnp.zeros_like(acc_ref)

    h = jnp.dot(xn_ref[...], wi_ref[...], preferred_element_type=jnp.float32)
    h = jnp.maximum(h, 0.0)                               # ReLU (feed_forward_proj='relu')
    acc_ref[...] += jnp.dot(h.astype(jnp.bfloat16), wo_ref[...],
                            preferred_element_type=jnp.float32)

    @pl.when(f == pl.num_programs(1) - 1)
    def _():
        o_ref[...] = acc_ref[...].astype(o_ref.dtype)


def pallas_ffn(x, gamma, wi, wo, eps=1e-6):
    B, T, D = x.shape
    M = B * T
    F = wi.shape[1]
    tm, Mp = _tile(M, 256, 8)
    tf, Fp = _tile(F, FFN_TF, 128)
    x_p = _pad2d(x.reshape(M, D).astype(jnp.bfloat16), Mp, D)
    wi_p = _pad2d(wi.astype(jnp.bfloat16), D, Fp)
    wo_p = _pad2d(wo.astype(jnp.bfloat16), Fp, D)
    out = pl.pallas_call(
        functools.partial(_ffn_kernel, eps=eps),
        out_shape=jax.ShapeDtypeStruct((Mp, D), jnp.bfloat16),
        grid=(Mp // tm, Fp // tf),
        in_specs=[pl.BlockSpec((tm, D), lambda i, f: (i, 0)),
                  pl.BlockSpec((1, D), lambda i, f: (0, 0)),
                  pl.BlockSpec((D, tf), lambda i, f: (0, f)),
                  pl.BlockSpec((tf, D), lambda i, f: (f, 0))],
        out_specs=pl.BlockSpec((tm, D), lambda i, f: (i, 0)),
        scratch_shapes=[pltpu.VMEM((tm, D), jnp.bfloat16),   # xn (reused over F tiles)
                        pltpu.VMEM((tm, D), jnp.float32)],   # f32 accumulator
        compiler_params=pltpu.CompilerParams(
            dimension_semantics=("parallel", "arbitrary"),
            vmem_limit_bytes=VMEM_LIMIT),
    )(x_p, gamma, wi_p, wo_p)
    if Mp != M:
        out = out[:M]
    return out.reshape(B, T, D)


# ----------------------------- standalone RMSNorm (row-tiled) -----------------------------

def _rmsnorm_kernel(x_ref, g_ref, o_ref, *, eps):
    x = x_ref[...].astype(jnp.float32)
    var = jnp.mean(x * x, axis=-1, keepdims=True)
    o_ref[...] = (x * jax.lax.rsqrt(var + eps) * g_ref[...]).astype(o_ref.dtype)


def pallas_rmsnorm(x, gamma, eps=1e-6):
    B, T, D = x.shape
    M = B * T
    tm, Mp = _tile(M, 512, 8)
    x_p = _pad2d(x.reshape(M, D).astype(jnp.bfloat16), Mp, D)
    out = pl.pallas_call(
        functools.partial(_rmsnorm_kernel, eps=eps),
        out_shape=jax.ShapeDtypeStruct((Mp, D), jnp.bfloat16),
        grid=(Mp // tm,),
        in_specs=[pl.BlockSpec((tm, D), lambda i: (i, 0)),
                  pl.BlockSpec((1, D), lambda i: (0, 0))],
        out_specs=pl.BlockSpec((tm, D), lambda i: (i, 0)),
        compiler_params=pltpu.CompilerParams(
            dimension_semantics=("parallel",),
            vmem_limit_bytes=VMEM_LIMIT),
    )(x_p, gamma)
    if Mp != M:
        out = out[:M]
    return out.reshape(B, T, D)


# ----------------------------- attention (heads folded in the lane dim) -----------------------------

def _softmax_attend(q, k, v, bias, mask):
    # q: (Tq, dk) bf16; k, v: (Tk, dk) bf16; bias: (Tq, Tk) f32 or None; mask: (1, Tk) f32 or None
    # T5: NO 1/sqrt(d_kv) scaling.
    s = jax.lax.dot_general(q, k, (((1,), (1,)), ((), ())),
                            preferred_element_type=jnp.float32)        # (Tq, Tk)
    if bias is not None:
        s = s + bias
    if mask is not None:
        s = s + mask
    mx = jnp.max(s, axis=-1, keepdims=True)
    p = jnp.exp(s - mx)
    denom = jnp.sum(p, axis=-1, keepdims=True)
    p = p * pl.reciprocal(denom, approx=True)    # ~2^-12 rel err: fine for training
    return jnp.dot(p.astype(v.dtype), v, preferred_element_type=jnp.float32)


def _self_attn_kernel(*args, H, dk, hbias, use_mask):
    # qkv_ref: (1, T, 3*H*dk) bf16, columns = [Q heads | K heads | V heads]
    # bias_ref: (Hb, T, T) bf16; mask_ref (optional): (1, 1, T) f32
    if use_mask:
        qkv_ref, bias_ref, mask_ref, o_ref = args
        mask = mask_ref[0].astype(jnp.float32)                 # (1, Tk) -> broadcast over Tq
    else:
        qkv_ref, bias_ref, o_ref = args
        mask = None
    hdk = H * dk
    for h in range(H):                                         # one head's scores live at a time
        q = qkv_ref[0, :, h * dk:(h + 1) * dk]
        k = qkv_ref[0, :, hdk + h * dk: hdk + (h + 1) * dk]
        v = qkv_ref[0, :, 2 * hdk + h * dk: 2 * hdk + (h + 1) * dk]
        b = bias_ref[h if hbias > 1 else 0].astype(jnp.float32)
        o = _softmax_attend(q, k, v, b, mask)
        o_ref[0, :, h * dk:(h + 1) * dk] = o.astype(o_ref.dtype)


def pallas_self_attention(qkv, bias, mask, H, dk):
    # qkv: (B, T, 3*H*dk) bf16; bias: (Hb, T, T) bf16; mask: (B, 1, T) f32 or None.
    # Output is lane-dense (B, T, H*dk): no HBM head transposes on either side.
    B, T, threeHDK = qkv.shape
    HDK = H * dk
    Hb = bias.shape[0]
    in_specs = [pl.BlockSpec((1, T, threeHDK), lambda b: (b, 0, 0)),
                pl.BlockSpec((Hb, T, T), lambda b: (0, 0, 0))]
    operands = [qkv, bias]
    if mask is not None:
        in_specs.append(pl.BlockSpec((1, 1, T), lambda b: (b, 0, 0)))
        operands.append(mask)
    return pl.pallas_call(
        functools.partial(_self_attn_kernel, H=H, dk=dk, hbias=Hb,
                          use_mask=mask is not None),
        out_shape=jax.ShapeDtypeStruct((B, T, HDK), jnp.bfloat16),
        grid=(B,),
        in_specs=in_specs,
        out_specs=pl.BlockSpec((1, T, HDK), lambda b: (b, 0, 0)),
        compiler_params=pltpu.CompilerParams(
            dimension_semantics=("parallel",),
            vmem_limit_bytes=VMEM_LIMIT),
    )(*operands)


def _cross_attn_kernel(q_ref, kv_ref, mask_ref, o_ref, *, H, dk):
    # q_ref: (1, Tq, H*dk); kv_ref: (1, Tk, 2*H*dk) = [K heads | V heads]; mask: (1, 1, Tk)
    hdk = H * dk
    mask = mask_ref[0].astype(jnp.float32)
    for h in range(H):
        q = q_ref[0, :, h * dk:(h + 1) * dk]
        k = kv_ref[0, :, h * dk:(h + 1) * dk]
        v = kv_ref[0, :, hdk + h * dk: hdk + (h + 1) * dk]
        o = _softmax_attend(q, k, v, None, mask)               # cross-attn has no rel bias
        o_ref[0, :, h * dk:(h + 1) * dk] = o.astype(o_ref.dtype)


def pallas_cross_attention(q, kv, mask, H, dk):
    B, Tq, HDK = q.shape
    Tk = kv.shape[1]
    return pl.pallas_call(
        functools.partial(_cross_attn_kernel, H=H, dk=dk),
        out_shape=jax.ShapeDtypeStruct((B, Tq, HDK), jnp.bfloat16),
        grid=(B,),
        in_specs=[pl.BlockSpec((1, Tq, HDK), lambda b: (b, 0, 0)),
                  pl.BlockSpec((1, Tk, 2 * HDK), lambda b: (b, 0, 0)),
                  pl.BlockSpec((1, 1, Tk), lambda b: (b, 0, 0))],
        out_specs=pl.BlockSpec((1, Tq, HDK), lambda b: (b, 0, 0)),
        compiler_params=pltpu.CompilerParams(
            dimension_semantics=("parallel",),
            vmem_limit_bytes=VMEM_LIMIT),
    )(q, kv, mask)


# ----------------------------- fused final-LN + LM head + cross-entropy -----------------------------

def _lmhead_ce_kernel(x_ref, g_ref, et_ref, lbl_ref,
                      logit_ref, loss_ref, cnt_ref,
                      xn_ref, m_scr, s_scr, t_scr, *, eps, scale, vocab, tv):
    j = pl.program_id(1)

    @pl.when(j == 0)
    def _():
        # final RMSNorm + tied-embedding rescale, hoisted off the vocab loop
        x = x_ref[...].astype(jnp.float32)
        var = jnp.mean(x * x, axis=-1, keepdims=True)
        xn_ref[...] = (x * jax.lax.rsqrt(var + eps) * g_ref[...] * scale).astype(jnp.bfloat16)
        m_scr[...] = jnp.full_like(m_scr, -1e30)
        s_scr[...] = jnp.zeros_like(s_scr)
        t_scr[...] = jnp.zeros_like(t_scr)

    # logits tile = xn @ emb_t_tile   (emb pre-transposed: standard ((1,),(0,)) contraction)
    logits = jnp.dot(xn_ref[...], et_ref[...], preferred_element_type=jnp.float32)  # (tm, tv)
    col = j * tv + jax.lax.broadcasted_iota(jnp.int32, logits.shape, 1)
    in_vocab = col < vocab
    lmask = jnp.where(in_vocab, logits, -1e30)
    logit_ref[...] = logits.astype(logit_ref.dtype)            # bf16 writeback (padded cols hold 0)

    lbl = lbl_ref[...]                                          # (tm, 1) int32
    m_new = jnp.maximum(m_scr[...], jnp.max(lmask, axis=-1, keepdims=True))
    s_scr[...] = (s_scr[...] * jnp.exp(m_scr[...] - m_new)
                  + jnp.sum(jnp.exp(lmask - m_new), axis=-1, keepdims=True))
    m_scr[...] = m_new
    t_scr[...] += jnp.sum(jnp.where((col == lbl) & in_vocab, logits, 0.0),
                          axis=-1, keepdims=True)

    @pl.when(j == pl.num_programs(1) - 1)
    def _():
        valid = (lbl != -100).astype(jnp.float32)
        loss_ref[...] = (m_scr[...] + jnp.log(s_scr[...]) - t_scr[...]) * valid
        cnt_ref[...] = valid


def pallas_lmhead_ce(dec_h2d, gamma, emb, labels1d, eps=1e-6, logits_dtype=jnp.bfloat16):
    N, D = dec_h2d.shape
    V = emb.shape[0]
    tm, Np = _tile(N, 256, 8)
    tv, Vp = _tile(V, LM_TV, 128)
    x_p = _pad2d(dec_h2d.astype(jnp.bfloat16), Np, D)
    # pre-transpose the tied embedding ONCE per forward (avoids a per-tile XLU transpose)
    et_p = _pad2d(jnp.transpose(emb.astype(jnp.bfloat16)), D, Vp)
    lbl = labels1d.astype(jnp.int32).reshape(N, 1)
    lbl_p = jnp.pad(lbl, ((0, Np - N), (0, 0)), constant_values=-100) if Np != N else lbl
    scale = float(D) ** -0.5                                    # tied word embeddings

    logits, loss, cnt = pl.pallas_call(
        functools.partial(_lmhead_ce_kernel, eps=eps, scale=scale, vocab=V, tv=tv),
        out_shape=(jax.ShapeDtypeStruct((Np, Vp), logits_dtype),
                   jax.ShapeDtypeStruct((Np, 1), jnp.float32),
                   jax.ShapeDtypeStruct((Np, 1), jnp.float32)),
        grid=(Np // tm, Vp // tv),
        in_specs=[pl.BlockSpec((tm, D), lambda i, j: (i, 0)),
                  pl.BlockSpec((1, D), lambda i, j: (0, 0)),
                  pl.BlockSpec((D, tv), lambda i, j: (0, j)),
                  pl.BlockSpec((tm, 1), lambda i, j: (i, 0))],
        out_specs=(pl.BlockSpec((tm, tv), lambda i, j: (i, j)),
                   pl.BlockSpec((tm, 1), lambda i, j: (i, 0)),
                   pl.BlockSpec((tm, 1), lambda i, j: (i, 0))),
        scratch_shapes=[pltpu.VMEM((tm, D), jnp.bfloat16),      # normalized rows (hoisted)
                        pltpu.VMEM((tm, 1), jnp.float32),       # running max
                        pltpu.VMEM((tm, 1), jnp.float32),       # running sum-exp
                        pltpu.VMEM((tm, 1), jnp.float32)],      # target logit
        compiler_params=pltpu.CompilerParams(
            dimension_semantics=("parallel", "arbitrary"),
            vmem_limit_bytes=VMEM_LIMIT),
    )(x_p, gamma, et_p, lbl_p)

    loss_sum = jnp.sum(loss[:N])
    cnt_sum = jnp.sum(cnt[:N])
    mean_loss = loss_sum / jnp.maximum(cnt_sum, 1.0)            # guard: all-ignored batch
    return mean_loss, logits[:N, :V]


# ----------------------------- T5 glue (plain JAX) -----------------------------

def _relative_position_bucket(relative_position, bidirectional):
    num_buckets = REL_NUM_BUCKETS
    relative_buckets = jnp.zeros_like(relative_position)
    if bidirectional:
        num_buckets = num_buckets // 2
        relative_buckets = relative_buckets + (relative_position > 0).astype(jnp.int32) * num_buckets
        relative_position = jnp.abs(relative_position)
    else:
        relative_position = -jnp.minimum(relative_position, 0)
    max_exact = num_buckets // 2
    is_small = relative_position < max_exact
    rel_if_large = max_exact + (
        jnp.log(jnp.maximum(relative_position, 1).astype(jnp.float32) / max_exact)
        / math.log(REL_MAX_DISTANCE / max_exact)
        * (num_buckets - max_exact)
    ).astype(jnp.int32)
    rel_if_large = jnp.minimum(rel_if_large, num_buckets - 1)
    relative_buckets = relative_buckets + jnp.where(is_small, relative_position, rel_if_large)
    return relative_buckets


def compute_rel_bias(rel_emb, q_len, k_len, bidirectional):
    context_position = jnp.arange(q_len)[:, None]
    memory_position = jnp.arange(k_len)[None, :]
    relative_position = memory_position - context_position
    rp_bucket = _relative_position_bucket(relative_position, bidirectional)
    values = rel_emb[rp_bucket]                       # (q, k, H)
    return jnp.transpose(values, (2, 0, 1))           # (H, q, k) f32


def t5_self_attention(x, p, ln_g, bias, mask, H, dk):
    B, T, D = x.shape
    HDK = H * dk
    # fused RMSNorm + concatenated [Q|K|V] projection; heads stay folded in the lane dim
    qkv = pallas_rms_matmul(x.reshape(B * T, D), ln_g, p['qkv'])     # (B*T, 3*HDK) bf16
    attn = pallas_self_attention(qkv.reshape(B, T, 3 * HDK), bias, mask, H, dk)  # (B,T,HDK)
    return pallas_matmul(attn.reshape(B * T, HDK), p['o']).reshape(B, T, D)


def t5_cross_attention(x_q, enc_h, p, ln_g, mask, H, dk):
    B, T, D = x_q.shape
    S = enc_h.shape[1]
    HDK = H * dk
    q = pallas_rms_matmul(x_q.reshape(B * T, D), ln_g, p['q']).reshape(B, T, HDK)
    kv = pallas_matmul(enc_h.reshape(B * S, D), p['kv']).reshape(B, S, 2 * HDK)
    attn = pallas_cross_attention(q, kv, mask, H, dk)                # (B, T, HDK)
    return pallas_matmul(attn.reshape(B * T, HDK), p['o']).reshape(B, T, D)


def tiger_forward(params, input_ids, attention_mask, labels, cfg):
    D, H, dk = cfg['d_model'], cfg['num_heads'], cfg['d_kv']
    pad_id = cfg['pad_token_id']
    emb = params['shared']                                         # (V, D) bf16
    B, S = input_ids.shape
    T = labels.shape[1]

    # ---------------- encoder ----------------
    enc_h = emb[input_ids]                                         # (B, S, D) bf16
    enc_mask = ((1.0 - attention_mask.astype(jnp.float32)) * NEG_MASK)[:, None, :]  # (B,1,S)
    enc_bias = compute_rel_bias(params['enc_rel'], S, S, True).astype(jnp.bfloat16)  # (H,S,S)
    for lp in params['enc_layers']:
        enc_h = enc_h + t5_self_attention(enc_h, lp['attn'], lp['ln1'], enc_bias, enc_mask, H, dk)
        enc_h = enc_h + pallas_ffn(enc_h, lp['ln2'], lp['wi'], lp['wo'])
    enc_h = pallas_rmsnorm(enc_h, params['enc_final_ln'])          # dropout_rate = 0.0

    # ---------------- decoder ----------------
    # shift labels right, prepend decoder_start_token_id (= pad), replace -100 with pad
    dec_in = jnp.concatenate([jnp.full((B, 1), pad_id, labels.dtype), labels[:, :-1]], axis=1)
    dec_in = jnp.where(dec_in == -100, pad_id, dec_in)
    dec_h = emb[dec_in]                                            # (B, T, D) bf16

    causal = jnp.tril(jnp.ones((T, T), jnp.float32))
    dec_bias = (compute_rel_bias(params['dec_rel'], T, T, False)
                + (1.0 - causal)[None] * NEG_MASK).astype(jnp.bfloat16)   # (H,T,T), causal folded in

    for lp in params['dec_layers']:
        dec_h = dec_h + t5_self_attention(dec_h, lp['self_attn'], lp['ln1'],
                                          dec_bias, None, H, dk)          # no padding mask -> skipped
        dec_h = dec_h + t5_cross_attention(dec_h, enc_h, lp['cross_attn'], lp['ln2'],
                                           enc_mask, H, dk)
        dec_h = dec_h + pallas_ffn(dec_h, lp['ln3'], lp['wi'], lp['wo'])

    # fused: final RMSNorm + d_model^-0.5 rescale + tied LM head + cross-entropy
    # (logits returned in bf16 to halve the model's largest HBM write; loss math is f32)
    loss, logits2d = pallas_lmhead_ce(dec_h.reshape(B * T, D), params['dec_final_ln'],
                                      emb, labels.reshape(-1))
    return loss, logits2d.reshape(B, T, -1)
    # TODO(synk): beam-search generate() is host-side control flow and is not ported to Pallas.


# ----------------------------- deterministic params -----------------------------

def init_params(key, cfg):
    D, F, H, dk, V = cfg['d_model'], cfg['d_ff'], cfg['num_heads'], cfg['d_kv'], cfg['vocab_size']
    HDK = H * dk
    keys = iter(jax.random.split(key, 256))

    def nrm(shape, scale, dtype=jnp.bfloat16):
        return (jax.random.normal(next(keys), shape, jnp.float32) * scale).astype(dtype)

    def ln():
        return jnp.ones((1, D), jnp.float32)

    def self_attn_p():
        # column layout: [Q heads | K heads | V heads], each head a dk-wide slice
        return dict(qkv=nrm((D, 3 * HDK), D ** -0.5), o=nrm((HDK, D), HDK ** -0.5))

    def cross_attn_p():
        # kv column layout: [K heads | V heads]
        return dict(q=nrm((D, HDK), D ** -0.5), kv=nrm((D, 2 * HDK), D ** -0.5),
                    o=nrm((HDK, D), HDK ** -0.5))

    def enc_layer():
        return dict(ln1=ln(), attn=self_attn_p(), ln2=ln(),
                    wi=nrm((D, F), D ** -0.5), wo=nrm((F, D), F ** -0.5))

    def dec_layer():
        return dict(ln1=ln(), self_attn=self_attn_p(), ln2=ln(), cross_attn=cross_attn_p(),
                    ln3=ln(), wi=nrm((D, F), D ** -0.5), wo=nrm((F, D), F ** -0.5))

    return dict(
        shared=nrm((V, D), 1.0),
        enc_rel=nrm((REL_NUM_BUCKETS, H), 1.0, jnp.float32),
        dec_rel=nrm((REL_NUM_BUCKETS, H), 1.0, jnp.float32),
        enc_layers=[enc_layer() for _ in range(cfg['num_layers'])],
        dec_layers=[dec_layer() for _ in range(cfg['num_decoder_layers'])],
        enc_final_ln=jnp.ones((1, D), jnp.float32),
        dec_final_ln=jnp.ones((1, D), jnp.float32),
    )


# ----------------------------- main -----------------------------

if __name__ == "__main__":
    cfg = dict(num_layers=2, num_decoder_layers=2, d_model=32, d_ff=64,
               num_heads=2, d_kv=8, dropout_rate=0.0, vocab_size=64,
               pad_token_id=0, eos_token_id=1, feed_forward_proj='relu')

    key = jax.random.PRNGKey(0)
    kp, ki, kl = jax.random.split(key, 3)
    params = init_params(kp, cfg)

    B, S_enc, T_dec = 2, 8, 5
    input_ids = jax.random.randint(ki, (B, S_enc), 2, cfg['vocab_size'], dtype=jnp.int32)
    attention_mask = jnp.ones((B, S_enc), jnp.int32).at[1, -2:].set(0)  # exercise padding mask
    labels = jax.random.randint(kl, (B, T_dec), 2, cfg['vocab_size'], dtype=jnp.int32)
    labels = labels.at[1, -1].set(-100)                                 # exercise ignore_index

    loss, logits = tiger_forward(params, input_ids, attention_mask, labels, cfg)
    jax.block_until_ready((loss, logits))
    assert logits.shape == (B, T_dec, cfg['vocab_size'])
    assert jnp.isfinite(loss)
    print("KERNEL_OK")
</pallas_src>

<mosaic_0001>
module attributes {stable_mosaic.version = 11 : i64} {
  func.func @_rms_mm_kernel(%arg0: i32, %arg1: i32, %arg2: memref<16x32xbf16, #tpu.memory_space<vmem>>, %arg3: memref<1x32xf32, #tpu.memory_space<vmem>>, %arg4: memref<32x48xbf16, #tpu.memory_space<vmem>>, %arg5: memref<16x48xbf16, #tpu.memory_space<vmem>>) attributes {dimension_semantics = [#tpu.dimension_semantics<parallel>, #tpu.dimension_semantics<parallel>], iteration_bounds = array<i64: 1, 1>, scalar_prefetch = 0 : i64, scratch_operands = 0 : i64, tpu.core_type = #tpu.core_type<tc>, window_params = [{transform_indices = @transform_0, window_bounds = array<i64: 16, 32>}, {pipeline_mode = #tpu.pipeline_mode<synchronous>, transform_indices = @transform_1, window_bounds = array<i64: 1, 32>}, {transform_indices = @transform_2, window_bounds = array<i64: 32, 48>}, {transform_indices = @transform_3, window_bounds = array<i64: 16, 48>}]} {
    %c0 = arith.constant 0 : index
    %c0_0 = arith.constant 0 : index
    %0 = vector.load %arg2[%c0, %c0_0] : memref<16x32xbf16, #tpu.memory_space<vmem>>, vector<16x32xbf16>
    %1 = arith.extf %0 : vector<16x32xbf16> to vector<16x32xf32>
    %2 = arith.mulf %1, %1 : vector<16x32xf32>
    %cst = arith.constant dense<0.000000e+00> : vector<16xf32>
    %3 = vector.multi_reduction <add>, %2, %cst [1] : vector<16x32xf32> to vector<16xf32>
    %4 = vector.shape_cast %3 : vector<16xf32> to vector<16x1xf32>
    %cst_1 = arith.constant 3.200000e+01 : f32
    %5 = vector.broadcast %cst_1 : f32 to vector<16x1xf32>
    %6 = arith.divf %4, %5 : vector<16x1xf32>
    %cst_2 = arith.constant 9.99999997E-7 : f32
    %7 = vector.broadcast %cst_2 : f32 to vector<16x1xf32>
    %8 = arith.addf %6, %7 : vector<16x1xf32>
    %9 = math.rsqrt %8 : vector<16x1xf32>
    %10 = vector.broadcast %9 : vector<16x1xf32> to vector<16x32xf32>
    %11 = arith.mulf %1, %10 : vector<16x32xf32>
    %c0_3 = arith.constant 0 : index
    %c0_4 = arith.constant 0 : index
    %12 = vector.load %arg3[%c0_3, %c0_4] : memref<1x32xf32, #tpu.memory_space<vmem>>, vector<1x32xf32>
    %13 = vector.broadcast %12 : vector<1x32xf32> to vector<16x32xf32>
    %14 = arith.mulf %11, %13 : vector<16x32xf32>
    %15 = arith.truncf %14 : vector<16x32xf32> to vector<16x32xbf16>
    %c0_5 = arith.constant 0 : index
    %c0_6 = arith.constant 0 : index
    %16 = vector.load %arg4[%c0_5, %c0_6] : memref<32x48xbf16, #tpu.memory_space<vmem>>, vector<32x48xbf16>
    %cst_7 = arith.constant dense<0.000000e+00> : vector<16x48xf32>
    %17 = tpu.matmul %15, %16, %cst_7 {dimension_numbers = #tpu.dot_dimension_numbers<[1], [0], [0], [1], [0, 0, 1, 1], [], []>} : vector<16x32xbf16>, vector<32x48xbf16>, vector<16x48xf32> -> vector<16x48xf32>
    %18 = arith.truncf %17 : vector<16x48xf32> to vector<16x48xbf16>
    %c0_8 = arith.constant 0 : index
    %c0_9 = arith.constant 0 : index
    %19 = vector.load %arg5[%c0_8, %c0_9] : memref<16x48xbf16, #tpu.memory_space<vmem>>, vector<16x48xbf16>
    tpu.vector_store %arg5[%c0_8, %c0_9], %18 {strides = array<i32>} : memref<16x48xbf16, #tpu.memory_space<vmem>>, vector<16x48xbf16>,
    return
  }
  func.func @transform_0(%arg0: i32, %arg1: i32) -> (i32, i32) {
    %c0_i32 = arith.constant 0 : i32
    %c0_i32_0 = arith.constant 0 : i32
    return %arg0, %c0_i32 : i32, i32
  }
  func.func @transform_1(%arg0: i32, %arg1: i32) -> (i32, i32) {
    %c0_i32 = arith.constant 0 : i32
    %c0_i32_0 = arith.constant 0 : i32
    %c0_i32_1 = arith.constant 0 : i32
    return %c0_i32, %c0_i32_0 : i32, i32
  }
  func.func @transform_2(%arg0: i32, %arg1: i32) -> (i32, i32) {
    %c0_i32 = arith.constant 0 : i32
    %c0_i32_0 = arith.constant 0 : i32
    return %c0_i32, %arg1 : i32, i32
  }
  func.func @transform_3(%arg0: i32, %arg1: i32) -> (i32, i32) {
    %c0_i32 = arith.constant 0 : i32
    return %arg0, %arg1 : i32, i32
  }
}

</mosaic_0001>

<bundles_post_ra>
// kernel: tpu_custom_call.1
= control target key start
LH: loop header
LB: loop body
LE: loop exit
PB: predicated region body
PF: predicated region fallthrough
CT: control target
= control target key end

     0   :  { %8 = vsyncpa [#allocation3], 0  ;;  %s354_s0 = inlined_call_operand.hbm [shape: bf16[16,32], index: 0, kind: input, shape index: {}]   ;;  %s355_s1 = inlined_call_operand.hbm [shape: f32[1,32], index: 1, kind: input, shape index: {}]   ;;  %s356_s2 = inlined_call_operand.hbm [shape: bf16[32,48], index: 2, kind: input, shape index: {}]   ;;  %s357_s3 = inlined_call_operand.hbm [shape: bf16[16,48], index: 3, kind: output, shape index: {}]  }
   0x1   :  { %9 = vsyncpa [#allocation6], 0  ;;  %s29_s14 = sshll.u32 %s355_s1, 4  ;;  %s30_s14 = int_to_ptr.hbm [resolvable:$true] %s29_s14 }
   0x2   :  { %10 = vsyncpa [#allocation4], 0  ;;  %s303_s15 = smov [#allocation5]   ;;  %s15_s19 = sshll.u32 %s354_s0, 4  ;;  %s16_s19 = int_to_ptr.hbm [resolvable:$true] %s15_s19 }
   0x3   :  { %s31_s16 = sshll.u32 %s303_s15, 4  ;;  %s304_s20 = smov [#allocation2]   ;;  %s32_s16 = int_to_ptr.vmem [resolvable:$true] %s31_s16 }
   0x4   :  { %34 = dma.hbm_to_vmem [thread:$0]  %s30_s14, 16, %s32_s16, [#allocation6]  }
   0x5   :  { %s17_s21 = sshll.u32 %s304_s20, 4  ;;  %s305_s22 = smov 64   ;;  %s18_s21 = int_to_ptr.vmem [resolvable:$true] %s17_s21 }
   0x6   :  { %s306_s23 = smov 4   ;;  %s39_s25 = sshll.u32 %s356_s2, 4  ;;  %s40_s25 = int_to_ptr.hbm [resolvable:$true] %s39_s25 }
   0x7   :  { %23 = dma.hbm_to_vmem [thread:$0]  %s16_s19, 128, %s18_s21, [#allocation3], %s305_s22, %s305_s22, %s306_s23  }
   0x8   :  { %s307_s26 = smov [#allocation7]  }
   0x9   :  { %s41_s27 = sshll.u32 %s307_s26, 4  ;;  %s42_s27 = int_to_ptr.vmem [resolvable:$true] %s41_s27 }
   0xa   :  { %47 = dma.hbm_to_vmem [thread:$0]  %s40_s25, 256, %s42_s27, [#allocation6], %s305_s22, %s305_s22, %s306_s23  }
   0xb   :  { %297 = dma.done.wait [#allocation3], 128  }
   0xc   :  { %298 = vsyncadd [#allocation3], 4294967168 }
   0xd   :  { %299 = dma.done.wait [#allocation6], 272  }
   0xe   :  { %300 = vsyncadd [#allocation6], 4294967024  ;;  %v184_v0 = vld [vmem:[#allocation2] sm:$0xff]   ;;  %vm67_vm0 = vcmask 261120   ;;  %v308_v7 = vmov 32.0   ;;  %v182_v13 = vld [vmem:[#allocation7 + $0x8] sm:$0xff] }
   0xf   :  { %v185_v1 = vunpack.c.l.bf16 %v184_v0  ;;  %v186_v3 = vunpack.c.h.bf16 %v184_v0  ;;  %195 = vrcp.f32 %v308_v7  ;;  %139 = vmatpush.bf16.msra.mxu0 %v182_v13  ;;  %v181_v15 = vld [vmem:[#allocation7] sm:$0xff]  ;;  %v194_v36 = vld [vmem:[#allocation5] ss:$0 sm:$0xff]  ;;  %vm149_vm8 = vcmask 388096   ;;  %s309_s0 = smov [#allocation8]   ;;  %s158_s30 = sshll.u32 %s357_s3, 4  ;;  %s159_s30 = int_to_ptr.hbm [resolvable:$true] %s158_s30 }
  0x10   :  { %s156_s2 = sshll.u32 %s309_s0, 4  ;;  %s157_s2 = int_to_ptr.vmem [resolvable:$true] %s156_s2 }
  0x11   :  { %v65_v2 = vmul.f32 %v185_v1, %v185_v1  ;;  %v66_v5 = vmul.f32 %v186_v3, %v186_v3 }
  0x13   :  { %v68_v4 = vsel %vm67_vm0, %v65_v2, 0.0  ;;  %v71_v6 = vsel %vm67_vm0, %v66_v5, 0.0  ;;  %140 = vmatpush.bf16.msra.mxu0 %v181_v15 }
  0x14   :  { %69 = vadd.xlane.f32.xlu0 %v68_v4 }
  0x15   :  { %v196_v8 = vpop.eup %195 }
  0x16   :  { %v75_v9 = vmul.f32 32.0, %v196_v8  ;;  %vm79_vm1 = vweird.f32 %v196_v8 }
  0x18   :  { %v76_v10 = vsub.f32 1.0, %v75_v9 }
  0x1a   :  { %v77_v11 = vmul.f32 %v196_v8, %v76_v10 }
  0x1c   :  { %72 = vadd.xlane.f32.xlu0 %v71_v6  ;;  %v78_v12 = vadd.f32 %v196_v8, %v77_v11 }
  0x1e   :  { %v80_v14 = vsel %vm79_vm1, %v196_v8, %v78_v12 }
  0x87   :  { %v70_v16 = vpop.xlane.xlu0 %69 }
  0x88   :  { %v81_v17 = vmul.f32 %v80_v14, %v70_v16 }
  0x8a   :  { %v83_v18 = vadd.f32 1e-06, %v81_v17 }
  0x8c   :  { %197 = vrsqrt.f32 %v83_v18  ;;  %vm91_vm3 = vweird.f32 %v83_v18 }
  0x8f   :  { %v73_v19 = vpop.xlane.xlu0 %72 }
  0x90   :  { %v82_v20 = vmul.f32 %v80_v14, %v73_v19 }
  0x92   :  { %v198_v21 = vpop.eup %197  ;;  %v84_v22 = vadd.f32 1e-06, %v82_v20 }
  0x93   :  { %v86_v23 = vmul.f32 %v198_v21, %v83_v18  ;;  %vm92_vm2 = vweird.f32 %v198_v21 }
  0x94   :  { %199 = vrsqrt.f32 %v84_v22  ;;  %vm93_vm4 = vmor %vm91_vm3, %vm92_vm2  ;;  %vm101_vm6 = vweird.f32 %v84_v22 }
  0x95   :  { %v87_v24 = vmul.f32 %v198_v21, %v86_v23 }
  0x97   :  { %v88_v25 = vmul.f32 0.5, %v87_v24 }
  0x99   :  { %v89_v26 = vsub.f32 1.5, %v88_v25 }
  0x9a   :  { %v200_v27 = vpop.eup %199 }
  0x9b   :  { %v96_v28 = vmul.f32 %v200_v27, %v84_v22  ;;  %v90_v29 = vmul.f32 %v198_v21, %v89_v26  ;;  %vm102_vm5 = vweird.f32 %v200_v27 }
  0x9c   :  { %vm103_vm7 = vmor %vm101_vm6, %vm102_vm5 }
  0x9d   :  { %v97_v30 = vmul.f32 %v200_v27, %v96_v28  ;;  %v94_v32 = vsel %vm93_vm4, %v198_v21, %v90_v29 }
  0x9e   :  { %v105_v35 = vmul.f32 %v185_v1, %v94_v32 }
  0x9f   :  { %v98_v31 = vmul.f32 0.5, %v97_v30 }
  0xa0   :  { %v111_v39 = vmul.f32 %v194_v36, %v105_v35 }
  0xa1   :  { %v99_v33 = vsub.f32 1.5, %v98_v31 }
  0xa3   :  { %v100_v34 = vmul.f32 %v200_v27, %v99_v33 }
  0xa5   :  { %v104_v37 = vsel %vm103_vm7, %v200_v27, %v100_v34 }
  0xa6   :  { %v106_v38 = vmul.f32 %v186_v3, %v104_v37 }
  0xa8   :  { %v112_v40 = vmul.f32 %v194_v36, %v106_v38 }
  0xaa   :  { %v113_v41 = vpack.c.bf16 %v112_v40, %v111_v39 }
  0xac   :  { %180 = vmatmul.msk.bf16.vlgmr.msra.gmra.mxu0 %vm67_vm0, %v113_v41 }
 0x129   :  { %v142_v42 = vpop.f32.mrf.mxu0 }
 0x12a   :  { %v147_v43 = vpack.c.bf16 %v142_v42, %v142_v42 }
 0x12c   :  { %150 = vst.msk [vmem:[#allocation8] sm:$0xf] %vm149_vm8, %v147_v43 }
 0x131   :  { %v144_v44 = vpop.f32.mrf.mxu0 }
 0x132   :  { %v148_v45 = vpack.c.bf16 %v144_v44, %v144_v44 }
 0x134   :  { %151 = vst.msk [vmem:[#allocation8 + $0x4] sm:$0xf] %vm149_vm8, %v148_v45 }
 0x135   :  { %164 = dma.vmem_to_hbm [thread:$0]  %s157_s2, 128, %s159_s30, [#allocation4], %s305_s22, %s305_s22, %s306_s23  }
 0x136   :  { %301 = dma.done.wait [#allocation4], 128  }
 0x137   :  { %302 = vsyncadd [#allocation4], 4294967168 }
 0x138   :  { %169 = vsyncpa [#allocation3], 1 }
 0x139   :  { %170 = vsyncpa [#allocation6], 1 }
 0x13a   :  { %171 = vsyncpa [#allocation4], 1 }

</bundles_post_ra>
